<compile_context>
chip_gen: v5e
topology: v5e:2x2
jax: 0.10.0
libtpu: 0.0.40
codegen_flags: <defaults>
</compile_context>

<pallas_src>
import functools

import jax
import jax.numpy as jnp
from jax.experimental import pallas as pl
from jax.experimental.pallas import tpu as pltpu


def _round_up(x, m):
    return (x + m - 1) // m * m


def _gaussian_mlp_kernel(n_hidden, activation, use_tanh, outputs, *refs):
    # refs = (x_ref, w0, b0, ..., w_{H}, b_{H}, out_ref)
    #   hidden layers: w_i (in_i, out_i), b_i (1, out_i)
    #   final layer  : w_H (hidden, 2*outputs) laid out [mean | variance]
    x_ref = refs[0]
    param_refs = refs[1:-1]
    out_ref = refs[-1]

    if activation == "relu":
        act = lambda v: jnp.maximum(v, 0.0)
    elif activation == "tanh":
        act = jnp.tanh
    elif activation == "sigmoid":
        act = jax.nn.sigmoid
    else:
        raise ValueError("Use 'relu','tanh' or 'sigmoid' as activation.")

    # Hidden layers: x = act(x @ W_i + b_i).  Dot operands take the weight
    # dtype (f32 or bf16); accumulation and all elementwise math stay f32.
    x = x_ref[...].astype(jnp.float32)
    for i in range(n_hidden):
        w = param_refs[2 * i][...]
        b = param_refs[2 * i + 1][...].astype(jnp.float32)   # (1, out) broadcast
        x = act(jnp.dot(x.astype(w.dtype), w,
                        preferred_element_type=jnp.float32) + b)

    # Fused final head: one matmul producing [mean | variance] lanes.
    wl = param_refs[2 * n_hidden][...]
    bl = param_refs[2 * n_hidden + 1][...].astype(jnp.float32)
    y = jnp.dot(x.astype(wl.dtype), wl,
                preferred_element_type=jnp.float32) + bl

    # Lanes [0, outputs) are the mean head, [outputs, 2*outputs) the variance
    # head — exactly the torch.split layout, so the final weight is used
    # unsplit and unpadded.
    lane = jax.lax.broadcasted_iota(jnp.int32, y.shape, 1)
    is_mean = lane < outputs
    softplus = jnp.maximum(y, 0.0) + jnp.log1p(jnp.exp(-jnp.abs(y)))
    mean = (jnp.tanh(y) + 1.0) * 0.5 if use_tanh else y
    out_ref[...] = jnp.where(is_mean, mean, softplus)


def pack_gaussian_mlp_params(weights, biases, param_dtype=jnp.float32):
    """Pre-pack the GaussianMLP parameters ONCE for the Pallas kernel.

    weights[i]: (in_i, out_i) (already transposed to (in, out));
    biases[i]: (out_i,).  The final layer must have 2*outputs units laid out
    [mean | variance], exactly as nn.Linear in GaussianMLP.  Biases become
    (1, out) rows so the kernel does a pure broadcast add.
    Use param_dtype=jnp.bfloat16 on v6e/v7x to halve parameter bytes and hit
    the native bf16 MXU path (elementwise math stays f32 inside the kernel).
    """
    packed = []
    for w, b in zip(weights, biases):
        packed.append(jnp.asarray(w, param_dtype))
        packed.append(jnp.asarray(b, param_dtype).reshape(1, -1))
    return tuple(packed)


def gaussian_mlp_forward(x, packed_params, *, outputs, activation="relu",
                         tanh=False, block_batch=512):
    """GaussianMLP forward pass as a single Pallas kernel.

    x: (batch, inputs) float array.  packed_params: output of
    pack_gaussian_mlp_params.  Returns (mean, variance), each (batch, outputs)
    float32, matching the PyTorch module semantics.
    """
    n_hidden = len(packed_params) // 2 - 1
    batch, in_features = x.shape
    out_width = 2 * outputs
    assert packed_params[-2].shape[-1] == out_width, \
        "final layer must have 2*outputs units ([mean | variance])"

    x = jnp.asarray(x, jnp.float32)

    # Batch tile: big (amortizes ~0.35us/grid-step) but capped so the grid has
    # >= 2 steps whenever batch >= 16 — keeps both v7x TensorCores fed.
    bm = max(8, min(_round_up(block_batch, 8),
                    _round_up(-(-batch // 2), 8)))
    batch_p = _round_up(batch, bm)
    if batch_p != batch:
        x = jnp.pad(x, ((0, batch_p - batch), (0, 0)))
    grid = (batch_p // bm,)

    kernel = functools.partial(_gaussian_mlp_kernel, n_hidden, activation,
                               tanh, outputs)

    x_spec = pl.BlockSpec((bm, in_features), lambda i: (i, 0))
    out_spec = pl.BlockSpec((bm, out_width), lambda i: (i, 0))
    out_shape = jax.ShapeDtypeStruct((batch_p, out_width), jnp.float32)

    # Explicit VMEM budget from the real footprint (v5e scoped default is only
    # 16 MiB; v7x physical VMEM is 64 MiB).  2x margin on params covers the
    # double-buffered fallback path.
    param_bytes = sum(int(p.size) * p.dtype.itemsize for p in packed_params)
    tile_bytes = bm * in_features * 4 + bm * out_width * 4
    vmem_limit = int(min(64 * 2 ** 20,
                         max(16 * 2 ** 20,
                             2 * param_bytes + 2 * tile_bytes + (2 << 20))))

    def build_call(single_buffer_params):
        in_specs = [x_spec]
        for p in packed_params:
            if single_buffer_params:
                # Constant-index blocks never change across the grid: single
                # buffer them to halve parameter VMEM.
                spec = pl.BlockSpec(p.shape, lambda i: (0, 0),
                                    pipeline_mode=pl.Buffered(1))
            else:
                spec = pl.BlockSpec(p.shape, lambda i: (0, 0))
            in_specs.append(spec)
        return pl.pallas_call(
            kernel,
            out_shape=out_shape,
            grid=grid,
            in_specs=in_specs,
            out_specs=out_spec,
            compiler_params=pltpu.CompilerParams(
                dimension_semantics=("parallel",),
                vmem_limit_bytes=vmem_limit),
        )

    try:
        y = build_call(True)(x, *packed_params)
    except Exception:
        # Fallback for JAX versions without BlockSpec pipeline_mode support:
        # identical kernel, default double-buffered parameter blocks.
        y = build_call(False)(x, *packed_params)

    if batch_p != batch:
        y = y[:batch]
    # Tiny (batch, outputs) column split; consumers that can take the fused
    # [mean | variance] array directly can skip it entirely.
    return y[:, :outputs], y[:, outputs:out_width]


def init_gaussian_mlp_params(key, inputs, outputs, hidden_layers):
    """PyTorch-Linear-style init: U(-1/sqrt(fan_in), 1/sqrt(fan_in)).

    Final layer has 2*outputs units (mean + variance), matching GaussianMLP.
    Weights are returned pre-transposed as (in, out).
    """
    net_structure = [inputs, *hidden_layers, 2 * outputs]
    weights, biases = [], []
    for i in range(len(net_structure) - 1):
        fan_in, fan_out = net_structure[i], net_structure[i + 1]
        key, kw, kb = jax.random.split(key, 3)
        bound = 1.0 / (fan_in ** 0.5)
        weights.append(jax.random.uniform(kw, (fan_in, fan_out), jnp.float32,
                                          minval=-bound, maxval=bound))
        biases.append(jax.random.uniform(kb, (fan_out,), jnp.float32,
                                         minval=-bound, maxval=bound))
    return weights, biases


def _reference_forward(x, weights, biases, outputs, activation="relu",
                       tanh=False):
    """Pure-JAX reference (mirrors the PyTorch forward) for correctness."""
    act = {"relu": lambda v: jnp.maximum(v, 0.0),
           "tanh": jnp.tanh,
           "sigmoid": jax.nn.sigmoid}[activation]
    h = x
    for w, b in zip(weights[:-1], biases[:-1]):
        h = act(h @ w + b)
    y = h @ weights[-1] + biases[-1]
    mean, variance = y[:, :outputs], y[:, outputs:2 * outputs]
    variance = jnp.log(1.0 + jnp.exp(variance))
    if tanh:
        mean = (jnp.tanh(mean) + 1.0) / 2.0
    return mean, variance


if __name__ == "__main__":
    key = jax.random.PRNGKey(0)

    # Small shapes consistent with the module (MLP over feature vectors).
    inputs, outputs, hidden_layers = 4, 2, [32]

    kx1, kx2, kp = jax.random.split(key, 3)
    weights, biases = init_gaussian_mlp_params(kp, inputs, outputs,
                                               hidden_layers)

    # Pre-pack parameters once; reused by every forward call below.
    params_f32 = pack_gaussian_mlp_params(weights, biases)

    # Case 1: relu, tanh=False, sublane-aligned batch.
    x1 = jax.random.normal(kx1, (8, inputs), dtype=jnp.float32)
    mean, variance = gaussian_mlp_forward(x1, params_f32, outputs=outputs,
                                          activation="relu", tanh=False)
    jax.block_until_ready((mean, variance))
    ref_mean, ref_var = _reference_forward(x1, weights, biases, outputs,
                                           activation="relu", tanh=False)
    assert mean.shape == (8, outputs) and variance.shape == (8, outputs)
    assert jnp.allclose(mean, ref_mean, atol=1e-5, rtol=1e-5)
    assert jnp.allclose(variance, ref_var, atol=1e-5, rtol=1e-5)
    assert bool(jnp.all(variance > 0.0))

    # Case 2: sigmoid + tanh-mean, ragged batch (exercises batch padding and a
    # multi-step "parallel" grid).
    x2 = jax.random.normal(kx2, (13, inputs), dtype=jnp.float32)
    mean2, var2 = gaussian_mlp_forward(x2, params_f32, outputs=outputs,
                                       activation="sigmoid", tanh=True)
    jax.block_until_ready((mean2, var2))
    ref_mean2, ref_var2 = _reference_forward(x2, weights, biases, outputs,
                                             activation="sigmoid", tanh=True)
    assert mean2.shape == (13, outputs) and var2.shape == (13, outputs)
    assert jnp.allclose(mean2, ref_mean2, atol=1e-5, rtol=1e-5)
    assert jnp.allclose(var2, ref_var2, atol=1e-5, rtol=1e-5)

    # Case 3: bf16 parameters (v6e/v7x MXU path); elementwise math stays f32.
    params_bf16 = pack_gaussian_mlp_params(weights, biases,
                                           param_dtype=jnp.bfloat16)
    mean3, var3 = gaussian_mlp_forward(x1, params_bf16, outputs=outputs,
                                       activation="relu", tanh=False)
    jax.block_until_ready((mean3, var3))
    assert jnp.allclose(mean3, ref_mean, atol=5e-2, rtol=5e-2)
    assert jnp.allclose(var3, ref_var, atol=5e-2, rtol=5e-2)

    print("KERNEL_OK")
</pallas_src>

<mosaic_0001>
module attributes {stable_mosaic.version = 11 : i64} {
  func.func @_gaussian_mlp_kernel(%arg0: i32, %arg1: memref<8x4xf32, #tpu.memory_space<vmem>>, %arg2: memref<4x32xf32, #tpu.memory_space<vmem>>, %arg3: memref<1x32xf32, #tpu.memory_space<vmem>>, %arg4: memref<32x4xf32, #tpu.memory_space<vmem>>, %arg5: memref<1x4xf32, #tpu.memory_space<vmem>>, %arg6: memref<8x4xf32, #tpu.memory_space<vmem>>) attributes {dimension_semantics = [#tpu.dimension_semantics<parallel>], iteration_bounds = array<i64: 1>, scalar_prefetch = 0 : i64, scratch_operands = 0 : i64, tpu.core_type = #tpu.core_type<tc>, window_params = [{transform_indices = @transform_0, window_bounds = array<i64: 8, 4>}, {pipeline_mode = #tpu.pipeline_mode<synchronous>, transform_indices = @transform_1, window_bounds = array<i64: 4, 32>}, {pipeline_mode = #tpu.pipeline_mode<synchronous>, transform_indices = @transform_2, window_bounds = array<i64: 1, 32>}, {pipeline_mode = #tpu.pipeline_mode<synchronous>, transform_indices = @transform_3, window_bounds = array<i64: 32, 4>}, {pipeline_mode = #tpu.pipeline_mode<synchronous>, transform_indices = @transform_4, window_bounds = array<i64: 1, 4>}, {transform_indices = @transform_5, window_bounds = array<i64: 8, 4>}]} {
    %c0 = arith.constant 0 : index
    %c0_0 = arith.constant 0 : index
    %0 = vector.load %arg1[%c0, %c0_0] : memref<8x4xf32, #tpu.memory_space<vmem>>, vector<8x4xf32>
    %c0_1 = arith.constant 0 : index
    %c0_2 = arith.constant 0 : index
    %1 = vector.load %arg2[%c0_1, %c0_2] : memref<4x32xf32, #tpu.memory_space<vmem>>, vector<4x32xf32>
    %c0_3 = arith.constant 0 : index
    %c0_4 = arith.constant 0 : index
    %2 = vector.load %arg3[%c0_3, %c0_4] : memref<1x32xf32, #tpu.memory_space<vmem>>, vector<1x32xf32>
    %cst = arith.constant dense<0.000000e+00> : vector<8x32xf32>
    %3 = tpu.matmul %0, %1, %cst {dimension_numbers = #tpu.dot_dimension_numbers<[1], [0], [0], [1], [0, 0, 1, 1], [], []>} : vector<8x4xf32>, vector<4x32xf32>, vector<8x32xf32> -> vector<8x32xf32>
    %4 = vector.broadcast %2 : vector<1x32xf32> to vector<8x32xf32>
    %5 = arith.addf %3, %4 : vector<8x32xf32>
    %cst_5 = arith.constant 0.000000e+00 : f32
    %6 = vector.broadcast %cst_5 : f32 to vector<8x32xf32>
    %7 = arith.maximumf %5, %6 : vector<8x32xf32>
    %c0_6 = arith.constant 0 : index
    %c0_7 = arith.constant 0 : index
    %8 = vector.load %arg4[%c0_6, %c0_7] : memref<32x4xf32, #tpu.memory_space<vmem>>, vector<32x4xf32>
    %c0_8 = arith.constant 0 : index
    %c0_9 = arith.constant 0 : index
    %9 = vector.load %arg5[%c0_8, %c0_9] : memref<1x4xf32, #tpu.memory_space<vmem>>, vector<1x4xf32>
    %cst_10 = arith.constant dense<0.000000e+00> : vector<8x4xf32>
    %10 = tpu.matmul %7, %8, %cst_10 {dimension_numbers = #tpu.dot_dimension_numbers<[1], [0], [0], [1], [0, 0, 1, 1], [], []>} : vector<8x32xf32>, vector<32x4xf32>, vector<8x4xf32> -> vector<8x4xf32>
    %11 = vector.broadcast %9 : vector<1x4xf32> to vector<8x4xf32>
    %12 = arith.addf %10, %11 : vector<8x4xf32>
    %13 = tpu.iota {dimensions = array<i32: 1>} : vector<8x4xi32>
    %c2_i32 = arith.constant 2 : i32
    %14 = vector.broadcast %c2_i32 : i32 to vector<8x4xi32>
    %15 = arith.cmpi slt, %13, %14 : vector<8x4xi32>
    %cst_11 = arith.constant 0.000000e+00 : f32
    %16 = vector.broadcast %cst_11 : f32 to vector<8x4xf32>
    %17 = arith.maximumf %12, %16 : vector<8x4xf32>
    %18 = math.absf %12 : vector<8x4xf32>
    %cst_12 = arith.constant 0.000000e+00 : f32
    %19 = vector.broadcast %cst_12 : f32 to vector<8x4xf32>
    %20 = arith.subf %19, %18 : vector<8x4xf32>
    %21 = math.exp %20 : vector<8x4xf32>
    %22 = math.log1p %21 : vector<8x4xf32>
    %23 = arith.addf %17, %22 : vector<8x4xf32>
    %24 = arith.select %15, %12, %23 : vector<8x4xi1>, vector<8x4xf32>
    %c0_13 = arith.constant 0 : index
    %c0_14 = arith.constant 0 : index
    %25 = vector.load %arg6[%c0_13, %c0_14] : memref<8x4xf32, #tpu.memory_space<vmem>>, vector<8x4xf32>
    tpu.vector_store %arg6[%c0_13, %c0_14], %24 {strides = array<i32>} : memref<8x4xf32, #tpu.memory_space<vmem>>, vector<8x4xf32>,
    return
  }
  func.func @transform_0(%arg0: i32) -> (i32, i32) {
    %c0_i32 = arith.constant 0 : i32
    %c0_i32_0 = arith.constant 0 : i32
    return %arg0, %c0_i32 : i32, i32
  }
  func.func @transform_1(%arg0: i32) -> (i32, i32) {
    %c0_i32 = arith.constant 0 : i32
    %c0_i32_0 = arith.constant 0 : i32
    %c0_i32_1 = arith.constant 0 : i32
    return %c0_i32, %c0_i32_0 : i32, i32
  }
  func.func @transform_2(%arg0: i32) -> (i32, i32) {
    %c0_i32 = arith.constant 0 : i32
    %c0_i32_0 = arith.constant 0 : i32
    %c0_i32_1 = arith.constant 0 : i32
    return %c0_i32, %c0_i32_0 : i32, i32
  }
  func.func @transform_3(%arg0: i32) -> (i32, i32) {
    %c0_i32 = arith.constant 0 : i32
    %c0_i32_0 = arith.constant 0 : i32
    %c0_i32_1 = arith.constant 0 : i32
    return %c0_i32, %c0_i32_0 : i32, i32
  }
  func.func @transform_4(%arg0: i32) -> (i32, i32) {
    %c0_i32 = arith.constant 0 : i32
    %c0_i32_0 = arith.constant 0 : i32
    %c0_i32_1 = arith.constant 0 : i32
    return %c0_i32, %c0_i32_0 : i32, i32
  }
  func.func @transform_5(%arg0: i32) -> (i32, i32) {
    %c0_i32 = arith.constant 0 : i32
    %c0_i32_0 = arith.constant 0 : i32
    return %arg0, %c0_i32 : i32, i32
  }
}

module attributes {stable_mosaic.version = 11 : i64} {
  func.func @_gaussian_mlp_kernel(%arg0: i32, %arg1: memref<8x4xf32, #tpu.memory_space<vmem>>, %arg2: memref<4x32xf32, #tpu.memory_space<vmem>>, %arg3: memref<1x32xf32, #tpu.memory_space<vmem>>, %arg4: memref<32x4xf32, #tpu.memory_space<vmem>>, %arg5: memref<1x4xf32, #tpu.memory_space<vmem>>, %arg6: memref<8x4xf32, #tpu.memory_space<vmem>>) attributes {dimension_semantics = [#tpu.dimension_semantics<parallel>], iteration_bounds = array<i64: 1>, scalar_prefetch = 0 : i64, scratch_operands = 0 : i64, tpu.core_type = #tpu.core_type<tc>, window_params = [{transform_indices = @transform_0, window_bounds = array<i64: 8, 4>}, {pipeline_mode = #tpu.pipeline_mode<synchronous>, transform_indices = @transform_1, window_bounds = array<i64: 4, 32>}, {pipeline_mode = #tpu.pipeline_mode<synchronous>, transform_indices = @transform_2, window_bounds = array<i64: 1, 32>}, {pipeline_mode = #tpu.pipeline_mode<synchronous>, transform_indices = @transform_3, window_bounds = array<i64: 32, 4>}, {pipeline_mode = #tpu.pipeline_mode<synchronous>, transform_indices = @transform_4, window_bounds = array<i64: 1, 4>}, {transform_indices = @transform_5, window_bounds = array<i64: 8, 4>}]} {
    %c0 = arith.constant 0 : index
    %c0_0 = arith.constant 0 : index
    %0 = vector.load %arg1[%c0, %c0_0] : memref<8x4xf32, #tpu.memory_space<vmem>>, vector<8x4xf32>
    %c0_1 = arith.constant 0 : index
    %c0_2 = arith.constant 0 : index
    %1 = vector.load %arg2[%c0_1, %c0_2] : memref<4x32xf32, #tpu.memory_space<vmem>>, vector<4x32xf32>
    %c0_3 = arith.constant 0 : index
    %c0_4 = arith.constant 0 : index
    %2 = vector.load %arg3[%c0_3, %c0_4] : memref<1x32xf32, #tpu.memory_space<vmem>>, vector<1x32xf32>
    %cst = arith.constant dense<0.000000e+00> : vector<8x32xf32>
    %3 = tpu.matmul %0, %1, %cst {dimension_numbers = #tpu.dot_dimension_numbers<[1], [0], [0], [1], [0, 0, 1, 1], [], []>} : vector<8x4xf32>, vector<4x32xf32>, vector<8x32xf32> -> vector<8x32xf32>
    %4 = vector.broadcast %2 : vector<1x32xf32> to vector<8x32xf32>
    %5 = arith.addf %3, %4 : vector<8x32xf32>
    %cst_5 = arith.constant 0.000000e+00 : f32
    %6 = vector.broadcast %cst_5 : f32 to vector<8x32xf32>
    %7 = arith.maximumf %5, %6 : vector<8x32xf32>
    %c0_6 = arith.constant 0 : index
    %c0_7 = arith.constant 0 : index
    %8 = vector.load %arg4[%c0_6, %c0_7] : memref<32x4xf32, #tpu.memory_space<vmem>>, vector<32x4xf32>
    %c0_8 = arith.constant 0 : index
    %c0_9 = arith.constant 0 : index
    %9 = vector.load %arg5[%c0_8, %c0_9] : memref<1x4xf32, #tpu.memory_space<vmem>>, vector<1x4xf32>
    %cst_10 = arith.constant dense<0.000000e+00> : vector<8x4xf32>
    %10 = tpu.matmul %7, %8, %cst_10 {dimension_numbers = #tpu.dot_dimension_numbers<[1], [0], [0], [1], [0, 0, 1, 1], [], []>} : vector<8x32xf32>, vector<32x4xf32>, vector<8x4xf32> -> vector<8x4xf32>
    %11 = vector.broadcast %9 : vector<1x4xf32> to vector<8x4xf32>
    %12 = arith.addf %10, %11 : vector<8x4xf32>
    %13 = tpu.iota {dimensions = array<i32: 1>} : vector<8x4xi32>
    %c2_i32 = arith.constant 2 : i32
    %14 = vector.broadcast %c2_i32 : i32 to vector<8x4xi32>
    %15 = arith.cmpi slt, %13, %14 : vector<8x4xi32>
    %cst_11 = arith.constant 0.000000e+00 : f32
    %16 = vector.broadcast %cst_11 : f32 to vector<8x4xf32>
    %17 = arith.maximumf %12, %16 : vector<8x4xf32>
    %18 = math.absf %12 : vector<8x4xf32>
    %cst_12 = arith.constant 0.000000e+00 : f32
    %19 = vector.broadcast %cst_12 : f32 to vector<8x4xf32>
    %20 = arith.subf %19, %18 : vector<8x4xf32>
    %21 = math.exp %20 : vector<8x4xf32>
    %22 = math.log1p %21 : vector<8x4xf32>
    %23 = arith.addf %17, %22 : vector<8x4xf32>
    %24 = arith.select %15, %12, %23 : vector<8x4xi1>, vector<8x4xf32>
    %c0_13 = arith.constant 0 : index
    %c0_14 = arith.constant 0 : index
    %25 = vector.load %arg6[%c0_13, %c0_14] : memref<8x4xf32, #tpu.memory_space<vmem>>, vector<8x4xf32>
    tpu.vector_store %arg6[%c0_13, %c0_14], %24 {strides = array<i32>} : memref<8x4xf32, #tpu.memory_space<vmem>>, vector<8x4xf32>,
    return
  }
  func.func @transform_0(%arg0: i32) -> (i32, i32) {
    %c0_i32 = arith.constant 0 : i32
    %c0_i32_0 = arith.constant 0 : i32
    return %arg0, %c0_i32 : i32, i32
  }
  func.func @transform_1(%arg0: i32) -> (i32, i32) {
    %c0_i32 = arith.constant 0 : i32
    %c0_i32_0 = arith.constant 0 : i32
    %c0_i32_1 = arith.constant 0 : i32
    return %c0_i32, %c0_i32_0 : i32, i32
  }
  func.func @transform_2(%arg0: i32) -> (i32, i32) {
    %c0_i32 = arith.constant 0 : i32
    %c0_i32_0 = arith.constant 0 : i32
    %c0_i32_1 = arith.constant 0 : i32
    return %c0_i32, %c0_i32_0 : i32, i32
  }
  func.func @transform_3(%arg0: i32) -> (i32, i32) {
    %c0_i32 = arith.constant 0 : i32
    %c0_i32_0 = arith.constant 0 : i32
    %c0_i32_1 = arith.constant 0 : i32
    return %c0_i32, %c0_i32_0 : i32, i32
  }
  func.func @transform_4(%arg0: i32) -> (i32, i32) {
    %c0_i32 = arith.constant 0 : i32
    %c0_i32_0 = arith.constant 0 : i32
    %c0_i32_1 = arith.constant 0 : i32
    return %c0_i32, %c0_i32_0 : i32, i32
  }
  func.func @transform_5(%arg0: i32) -> (i32, i32) {
    %c0_i32 = arith.constant 0 : i32
    %c0_i32_0 = arith.constant 0 : i32
    return %arg0, %c0_i32 : i32, i32
  }
}

</mosaic_0001>

<bundles_post_ra>
// kernel: tpu_custom_call.1
= control target key start
LH: loop header
LB: loop body
LE: loop exit
PB: predicated region body
PF: predicated region fallthrough
CT: control target
= control target key end

     0   :  { %vm30_vm0 = vcmask 1043456   ;;  %vm26_vm1 = vcmask 31744   ;;  %vm63_vm2 = vcmask 261120   ;;  %v87_v19 = vlaneseq  ;;  %s179_s1 = inlined_call_operand.vmem [shape: f32[4,32], index: 1, kind: input, shape index: {}]   ;;  %s180_s0 = inlined_call_operand.vmem [shape: f32[8,4], index: 0, kind: input, shape index: {}]   ;;  %s181_s3 = inlined_call_operand.vmem [shape: f32[32,4], index: 3, kind: input, shape index: {}]   ;;  %s182_s2 = inlined_call_operand.vmem [shape: f32[1,32], index: 2, kind: input, shape index: {}]   ;;  %s183_s4 = inlined_call_operand.vmem [shape: f32[1,4], index: 4, kind: input, shape index: {}]   ;;  %s184_s5 = inlined_call_operand.vmem [shape: f32[8,4], index: 5, kind: output, shape index: {}]  }
   0x1   :  { %v21_v0 = vld [vmem:[%s179_s1] sm:$0xf]  ;;  %v58_v2 = vld [vmem:[%s181_s3 + $0x18] sm:$0xff]  ;;  %v57_v3 = vld [vmem:[%s181_s3 + $0x10] sm:$0xff] }
   0x2   :  { %v20_v1 = vld [vmem:[%s180_s0] sm:$0xff]  ;;  %111 = vmatpush.msk.msra.mxu0 %vm30_vm0, %v21_v0  ;;  %79 = vmatpush.msra.mxu1 %v58_v2  ;;  %v56_v4 = vld [vmem:[%s181_s3 + $0x8] sm:$0xff]  ;;  %v88_v22 = vand.u32 127, %v87_v19 }
   0x3   :  { %112 = vmatmul.msk.f32.vlgmr.msra.gmra.mxu0 %vm26_vm1, %v20_v1  ;;  %v55_v5 = vld [vmem:[%s181_s3] sm:$0xff] }
   0x4   :  { %80 = vmatpush.msra.mxu1 %v57_v3  ;;  %v114_v6 = vld [vmem:[%s182_s2] ss:$0 sm:$0xff]  ;;  %vm89_vm4 = vcmp.lt.s32.totalorder %v88_v22, 2 }
   0x5   :  { %v115_v10 = vld [vmem:[%s183_s4] ss:$0 sm:$0xff] }
   0x6   :  { %81 = vmatpush.msra.mxu1 %v56_v4 }
   0x8   :  { %82 = vmatpush.msra.mxu1 %v55_v5 }
  0x80   :  { %v51_v7 = vpop.f32.mrf.mxu0 }
  0x81   :  { %v52_v8 = vadd.f32 %v114_v6, %v51_v7 }
  0x83   :  { %v54_v9 = vmax.f32 %v52_v8, 0.0 }
  0x85   :  { %113 = vmatmul.msk.f32.vlgmr.msra.gmra.mxu1 %vm63_vm2, %v54_v9 }
 0x102   :  { %v84_v11 = vpop.f32.mrf.mxu1 }
 0x103   :  { %v85_v12 = vadd.f32 %v115_v10, %v84_v11 }
 0x105   :  { %v91_v13 = vand.u32 2147483647, %v85_v12  ;;  %v90_v26 = vmax.f32 %v85_v12, 0.0 }
 0x107   :  { %v92_v14 = vsub.f32 0.0, %v91_v13 }
 0x109   :  { %v93_v15 = vmul.f32 1.442695, %v92_v14 }
 0x10b   :  { %116 = vpow2.f32 %v93_v15 }
 0x111   :  { %v117_v16 = vpop.eup %116 }
 0x112   :  { %v95_v17 = vadd.f32 1.0, %v117_v16  ;;  %v98_v18 = vmul.f32 -0.5, %v117_v16  ;;  %v101_v21 = vand.u32 2147483647, %v117_v16 }
 0x114   :  { %118 = vlog2.f32 %v95_v17  ;;  %v99_v20 = vadd.f32 1.0, %v98_v18  ;;  %vm102_vm3 = vcmp.lt.f32.partialorder %v101_v21, 0.0004427343 }
 0x116   :  { %v100_v25 = vmul.f32 %v117_v16, %v99_v20 }
 0x11a   :  { %v119_v23 = vpop.eup %118 }
 0x11b   :  { %v97_v24 = vmul.f32 0.6931472, %v119_v23 }
 0x11d   :  { %v103_v27 = vsel %vm102_vm3, %v100_v25, %v97_v24 }
 0x11e   :  { %v104_v28 = vadd.f32 %v103_v27, %v90_v26 }
 0x120   :  { %v105_v29 = vsel %vm89_vm4, %v85_v12, %v104_v28 }
 0x121   :  { %106 = vst.msk [vmem:[%s184_s5] sm:$0xff] %vm26_vm1, %v105_v29 }

// kernel: tpu_custom_call.1
= control target key start
LH: loop header
LB: loop body
LE: loop exit
PB: predicated region body
PF: predicated region fallthrough
CT: control target
= control target key end

     0   :  { %vm30_vm0 = vcmask 1043456   ;;  %vm26_vm1 = vcmask 31744   ;;  %vm63_vm2 = vcmask 261120   ;;  %v87_v19 = vlaneseq  ;;  %s179_s1 = inlined_call_operand.vmem [shape: f32[4,32], index: 1, kind: input, shape index: {}]   ;;  %s180_s0 = inlined_call_operand.vmem [shape: f32[8,4], index: 0, kind: input, shape index: {}]   ;;  %s181_s3 = inlined_call_operand.vmem [shape: f32[32,4], index: 3, kind: input, shape index: {}]   ;;  %s182_s2 = inlined_call_operand.vmem [shape: f32[1,32], index: 2, kind: input, shape index: {}]   ;;  %s183_s4 = inlined_call_operand.vmem [shape: f32[1,4], index: 4, kind: input, shape index: {}]   ;;  %s184_s5 = inlined_call_operand.vmem [shape: f32[8,4], index: 5, kind: output, shape index: {}]  }
   0x1   :  { %v21_v0 = vld [vmem:[%s179_s1] sm:$0xf]  ;;  %v58_v2 = vld [vmem:[%s181_s3 + $0x18] sm:$0xff]  ;;  %v57_v3 = vld [vmem:[%s181_s3 + $0x10] sm:$0xff] }
   0x2   :  { %v20_v1 = vld [vmem:[%s180_s0] sm:$0xff]  ;;  %111 = vmatpush.msk.msra.mxu0 %vm30_vm0, %v21_v0  ;;  %79 = vmatpush.msra.mxu1 %v58_v2  ;;  %v56_v4 = vld [vmem:[%s181_s3 + $0x8] sm:$0xff]  ;;  %v88_v22 = vand.u32 127, %v87_v19 }
   0x3   :  { %112 = vmatmul.msk.f32.vlgmr.msra.gmra.mxu0 %vm26_vm1, %v20_v1  ;;  %v55_v5 = vld [vmem:[%s181_s3] sm:$0xff] }
   0x4   :  { %80 = vmatpush.msra.mxu1 %v57_v3  ;;  %v114_v6 = vld [vmem:[%s182_s2] ss:$0 sm:$0xff]  ;;  %vm89_vm4 = vcmp.lt.s32.totalorder %v88_v22, 2 }
   0x5   :  { %v115_v10 = vld [vmem:[%s183_s4] ss:$0 sm:$0xff] }
   0x6   :  { %81 = vmatpush.msra.mxu1 %v56_v4 }
   0x8   :  { %82 = vmatpush.msra.mxu1 %v55_v5 }
  0x80   :  { %v51_v7 = vpop.f32.mrf.mxu0 }
  0x81   :  { %v52_v8 = vadd.f32 %v114_v6, %v51_v7 }
  0x83   :  { %v54_v9 = vmax.f32 %v52_v8, 0.0 }
  0x85   :  { %113 = vmatmul.msk.f32.vlgmr.msra.gmra.mxu1 %vm63_vm2, %v54_v9 }
 0x102   :  { %v84_v11 = vpop.f32.mrf.mxu1 }
 0x103   :  { %v85_v12 = vadd.f32 %v115_v10, %v84_v11 }
 0x105   :  { %v91_v13 = vand.u32 2147483647, %v85_v12  ;;  %v90_v26 = vmax.f32 %v85_v12, 0.0 }
 0x107   :  { %v92_v14 = vsub.f32 0.0, %v91_v13 }
 0x109   :  { %v93_v15 = vmul.f32 1.442695, %v92_v14 }
 0x10b   :  { %116 = vpow2.f32 %v93_v15 }
 0x111   :  { %v117_v16 = vpop.eup %116 }
 0x112   :  { %v95_v17 = vadd.f32 1.0, %v117_v16  ;;  %v98_v18 = vmul.f32 -0.5, %v117_v16  ;;  %v101_v21 = vand.u32 2147483647, %v117_v16 }
 0x114   :  { %118 = vlog2.f32 %v95_v17  ;;  %v99_v20 = vadd.f32 1.0, %v98_v18  ;;  %vm102_vm3 = vcmp.lt.f32.partialorder %v101_v21, 0.0004427343 }
 0x116   :  { %v100_v25 = vmul.f32 %v117_v16, %v99_v20 }
 0x11a   :  { %v119_v23 = vpop.eup %118 }
 0x11b   :  { %v97_v24 = vmul.f32 0.6931472, %v119_v23 }
 0x11d   :  { %v103_v27 = vsel %vm102_vm3, %v100_v25, %v97_v24 }
 0x11e   :  { %v104_v28 = vadd.f32 %v103_v27, %v90_v26 }
 0x120   :  { %v105_v29 = vsel %vm89_vm4, %v85_v12, %v104_v28 }
 0x121   :  { %106 = vst.msk [vmem:[%s184_s5] sm:$0xff] %vm26_vm1, %v105_v29 }

</bundles_post_ra>
